<compile_context>
chip_gen: v7x
topology: tpu7x:2x2x1
jax: 0.10.0
libtpu: 0.0.40
codegen_flags: <defaults>
</compile_context>

<pallas_src>
import jax
import jax.numpy as jnp
from jax.experimental import pallas as pl
from jax.experimental.pallas import tpu as pltpu


H_PAD = 128  # hidden width padded to a full lane group (model hidden = 64)


def _round_up(n, m):
    return ((n + m - 1) // m) * m


# ----------------------------- Pallas kernel ------------------------------ #
def critic_kernel(x_ref, w1_ref, w23_ref, misc_ref, o_ref):
    """Fused Critic forward: fc1 + fc2 + fc3 (ReLU) + q head, one batch tile."""
    # Packed f32 slab: rows 0-2 biases, row 3 = q_out weight row, [4,0] = q bias.
    b1 = misc_ref[0:1, :]
    b2 = misc_ref[1:2, :]
    b3 = misc_ref[2:3, :]
    w4 = misc_ref[3:4, :]
    b4 = misc_ref[4:5, 0:1]

    # layer 1: single bf16 MXU matmul over the fused (state | action/max_a) input
    h = jnp.maximum(
        jnp.dot(x_ref[...], w1_ref[...], preferred_element_type=jnp.float32) + b1,
        0.0)
    # layers 2 & 3: bf16 MXU, f32 accumulate, f32 bias / ReLU
    h = jnp.maximum(
        jnp.dot(h.astype(jnp.bfloat16), w23_ref[0],
                preferred_element_type=jnp.float32) + b2, 0.0)
    h = jnp.maximum(
        jnp.dot(h.astype(jnp.bfloat16), w23_ref[1],
                preferred_element_type=jnp.float32) + b3, 0.0)

    # q head (64 -> 1): VPU multiply + lane reduce, no N=1 MXU pass.
    q = jnp.sum(h * w4, axis=-1, keepdims=True) + b4          # (tile_b, 1)
    # lane-dense store: broadcast q across all 128 lanes (unmasked vst).
    o_ref[...] = jnp.broadcast_to(q, o_ref.shape)


# ------------------------------ host wrapper ------------------------------ #
def preprocess(state, action, max_action):
    """Exactly the PyTorch preprocessing (scale, permute, reshape, concat),
       plus K-padding to a multiple of 32 and cast to bf16."""
    _, batch, _ = state.shape
    x = jnp.concatenate(
        [jnp.transpose(state, (1, 0, 2)).reshape(batch, -1),
         jnp.transpose(action / max_action, (1, 0, 2)).reshape(batch, -1)],
        axis=1)
    k_pad = _round_up(x.shape[1], 32)
    x = jnp.pad(x, ((0, 0), (0, k_pad - x.shape[1])))
    return x.astype(jnp.bfloat16)


def critic_pallas(state, action, kp, max_action, tile_b=None):
    """state: (n_agents, batch, dim_s) f32; action: (n_agents, batch, dim_a) f32.
       kp: packed kernel parameters (see build_kernel_params)."""
    x = preprocess(state, action, max_action)
    batch, k_pad = x.shape
    assert k_pad == kp["w1"].shape[0]

    if tile_b is None:
        tile_b = batch if batch <= 256 else 256
    assert batch % tile_b == 0, "batch must be a multiple of tile_b"
    grid = (batch // tile_b,)

    out = pl.pallas_call(
        critic_kernel,
        out_shape=jax.ShapeDtypeStruct((batch, H_PAD), jnp.float32),
        grid=grid,
        in_specs=[
            pl.BlockSpec((tile_b, k_pad), lambda i: (i, 0)),        # x tile
            pl.BlockSpec((k_pad, H_PAD), lambda i: (0, 0)),         # w1 (pinned)
            pl.BlockSpec((2, H_PAD, H_PAD), lambda i: (0, 0, 0)),   # w2/w3 (pinned)
            pl.BlockSpec((8, H_PAD), lambda i: (0, 0)),             # biases + q head
        ],
        out_specs=pl.BlockSpec((tile_b, H_PAD), lambda i: (i, 0)),
        compiler_params=pltpu.CompilerParams(
            dimension_semantics=("parallel",)),
    )(x, kp["w1"], kp["w23"], kp["misc"])
    return out[:, :1]                                # q column (batch, 1)


# ------------------------- parameter construction ------------------------- #
def make_noisy_linear(key, in_features, out_features):
    """Effective (weight, bias) exactly like the PyTorch noisy Linear:
       w = w_mean + w_std * U[0,1),  b = b_mean + b_std * U[0,1).
       Returned weight is (in, out) so the kernel can do x @ w."""
    k_wm, k_ws, k_bm, k_bs, k_ew, k_eb = jax.random.split(key, 6)
    w_mean = jax.random.uniform(k_wm, (out_features, in_features),
                                minval=-0.1, maxval=0.1, dtype=jnp.float32)
    w_std = jax.random.uniform(k_ws, (out_features, in_features),
                               minval=-0.1, maxval=0.1, dtype=jnp.float32)
    b_mean = jax.random.uniform(k_bm, (out_features,),
                                minval=-0.1, maxval=0.1, dtype=jnp.float32)
    b_std = jax.random.uniform(k_bs, (out_features,),
                               minval=-0.1, maxval=0.1, dtype=jnp.float32)
    eps_w = jax.random.uniform(k_ew, (out_features, in_features),
                               minval=0.0, maxval=1.0, dtype=jnp.float32)
    eps_b = jax.random.uniform(k_eb, (out_features,),
                               minval=0.0, maxval=1.0, dtype=jnp.float32)
    w = w_mean + w_std * eps_w                  # (out, in)
    b = b_mean + b_std * eps_b                  # (out,)
    return w.T, b                               # (in, out), (out,)


def build_kernel_params(raw_params, in_dim):
    """Pack the four effective (w, b) pairs into three DMA slabs:
       w1 (K_pad,128) bf16, w23 (2,128,128) bf16, misc (8,128) f32."""
    (w1, b1), (w2, b2), (w3, b3), (w4, b4) = raw_params
    hidden = w1.shape[1]                        # 64
    k_pad = _round_up(in_dim, 32)

    w1p = jnp.pad(w1, ((0, k_pad - in_dim), (0, H_PAD - hidden)))
    sq = ((0, H_PAD - hidden), (0, H_PAD - hidden))
    w23 = jnp.stack([jnp.pad(w2, sq), jnp.pad(w3, sq)])

    misc = jnp.zeros((8, H_PAD), jnp.float32)
    misc = misc.at[0, :hidden].set(b1)
    misc = misc.at[1, :hidden].set(b2)
    misc = misc.at[2, :hidden].set(b3)
    misc = misc.at[3, :hidden].set(w4[:, 0])    # q_out weight as a 128-lane row
    misc = misc.at[4, 0].set(b4[0])             # q_out bias scalar

    return {"w1": w1p.astype(jnp.bfloat16),
            "w23": w23.astype(jnp.bfloat16),
            "misc": misc}


# --------------------------------- main ----------------------------------- #
if __name__ == "__main__":
    # Small synthetic config consistent with the module's __init__.
    n_agents = 3
    input_dim_self = 4
    action_shape = [2, 2, 2]        # per-agent action dims (sum = 6)
    batch_size = 8
    high_action = 1.0
    hidden = 64

    dim_a = action_shape[0]
    # The PyTorch module permutes a single `action` tensor, so per-agent action
    # dims must be uniform (as here).
    assert sum(action_shape) == n_agents * dim_a
    in_dim = input_dim_self * n_agents + sum(action_shape)   # 12 + 6 = 18

    root = jax.random.PRNGKey(0)
    k_s, k_a, k1, k2, k3, k4 = jax.random.split(root, 6)

    state = jax.random.normal(k_s, (n_agents, batch_size, input_dim_self),
                              dtype=jnp.float32)
    action = jax.random.normal(k_a, (n_agents, batch_size, dim_a),
                               dtype=jnp.float32)

    # Noise (epsilon) is sampled here, once.  The PyTorch module resamples
    # epsilon on every forward; to mirror that, rebuild raw_params/kp per call
    # (cheap JAX glue outside the kernel).
    # TODO(synk): per-forward epsilon resampling is left to the caller.
    raw_params = [
        make_noisy_linear(k1, in_dim, hidden),   # fc1
        make_noisy_linear(k2, hidden, hidden),   # fc2
        make_noisy_linear(k3, hidden, hidden),   # fc3
        make_noisy_linear(k4, hidden, 1),        # q_out
    ]
    kp = build_kernel_params(raw_params, in_dim)

    fwd = jax.jit(critic_pallas)
    q = jax.block_until_ready(fwd(state, action, kp, high_action))
    assert q.shape == (batch_size, 1)

    # --- reference 1: exact PyTorch-semantics forward in pure f32 ---------- #
    act_n = action / high_action
    x_ref = jnp.concatenate(
        [jnp.transpose(state, (1, 0, 2)).reshape(batch_size, -1),
         jnp.transpose(act_n, (1, 0, 2)).reshape(batch_size, -1)], axis=1)
    h = x_ref
    for i, (w, b) in enumerate(raw_params):
        h = h @ w + b
        if i < 3:
            h = jnp.maximum(h, 0.0)
    assert jnp.allclose(q, h, atol=1e-1), "semantic mismatch vs f32 reference"

    # --- reference 2: same bf16/f32 math as the kernel (tight tolerance) --- #
    x_bf = preprocess(state, action, high_action)
    m = kp["misc"]
    hr = jnp.maximum(
        jnp.dot(x_bf, kp["w1"], preferred_element_type=jnp.float32) + m[0:1], 0.0)
    hr = jnp.maximum(
        jnp.dot(hr.astype(jnp.bfloat16), kp["w23"][0],
                preferred_element_type=jnp.float32) + m[1:2], 0.0)
    hr = jnp.maximum(
        jnp.dot(hr.astype(jnp.bfloat16), kp["w23"][1],
                preferred_element_type=jnp.float32) + m[2:3], 0.0)
    qr = jnp.sum(hr * m[3:4], axis=-1, keepdims=True) + m[4, 0]
    assert jnp.allclose(q, qr, atol=1e-3, rtol=1e-3), "kernel math mismatch"

    print("KERNEL_OK")
</pallas_src>

<mosaic_0001>
module attributes {stable_mosaic.version = 11 : i64} {
  func.func @critic_kernel(%arg0: i32, %arg1: memref<8x32xbf16, #tpu.memory_space<vmem>>, %arg2: memref<32x128xbf16, #tpu.memory_space<vmem>>, %arg3: memref<2x128x128xbf16, #tpu.memory_space<vmem>>, %arg4: memref<8x128xf32, #tpu.memory_space<vmem>>, %arg5: memref<8x128xf32, #tpu.memory_space<vmem>>) attributes {dimension_semantics = [#tpu.dimension_semantics<parallel>], iteration_bounds = array<i64: 1>, scalar_prefetch = 0 : i64, scratch_operands = 0 : i64, tpu.core_type = #tpu.core_type<tc>, window_params = [{transform_indices = @transform_0, window_bounds = array<i64: 8, 32>}, {pipeline_mode = #tpu.pipeline_mode<synchronous>, transform_indices = @transform_1, window_bounds = array<i64: 32, 128>}, {pipeline_mode = #tpu.pipeline_mode<synchronous>, transform_indices = @transform_2, window_bounds = array<i64: 2, 128, 128>}, {pipeline_mode = #tpu.pipeline_mode<synchronous>, transform_indices = @transform_3, window_bounds = array<i64: 8, 128>}, {transform_indices = @transform_4, window_bounds = array<i64: 8, 128>}]} {
    %c0 = arith.constant 0 : index
    %c0_0 = arith.constant 0 : index
    %0 = vector.load %arg4[%c0, %c0_0] : memref<8x128xf32, #tpu.memory_space<vmem>>, vector<1x128xf32>
    %c1 = arith.constant 1 : index
    %c0_1 = arith.constant 0 : index
    %1 = vector.load %arg4[%c1, %c0_1] : memref<8x128xf32, #tpu.memory_space<vmem>>, vector<1x128xf32>
    %c2 = arith.constant 2 : index
    %c0_2 = arith.constant 0 : index
    %2 = vector.load %arg4[%c2, %c0_2] : memref<8x128xf32, #tpu.memory_space<vmem>>, vector<1x128xf32>
    %c3 = arith.constant 3 : index
    %c0_3 = arith.constant 0 : index
    %3 = vector.load %arg4[%c3, %c0_3] : memref<8x128xf32, #tpu.memory_space<vmem>>, vector<1x128xf32>
    %c4 = arith.constant 4 : index
    %c0_4 = arith.constant 0 : index
    %4 = vector.load %arg4[%c4, %c0_4] : memref<8x128xf32, #tpu.memory_space<vmem>>, vector<1x1xf32>
    %c0_5 = arith.constant 0 : index
    %c0_6 = arith.constant 0 : index
    %5 = vector.load %arg1[%c0_5, %c0_6] : memref<8x32xbf16, #tpu.memory_space<vmem>>, vector<8x32xbf16>
    %c0_7 = arith.constant 0 : index
    %c0_8 = arith.constant 0 : index
    %6 = vector.load %arg2[%c0_7, %c0_8] : memref<32x128xbf16, #tpu.memory_space<vmem>>, vector<32x128xbf16>
    %cst = arith.constant dense<0.000000e+00> : vector<8x128xf32>
    %7 = tpu.matmul %5, %6, %cst {dimension_numbers = #tpu.dot_dimension_numbers<[1], [0], [0], [1], [0, 0, 1, 1], [], []>} : vector<8x32xbf16>, vector<32x128xbf16>, vector<8x128xf32> -> vector<8x128xf32>
    %8 = vector.broadcast %0 : vector<1x128xf32> to vector<8x128xf32>
    %9 = arith.addf %7, %8 : vector<8x128xf32>
    %cst_9 = arith.constant 0.000000e+00 : f32
    %10 = vector.broadcast %cst_9 : f32 to vector<8x128xf32>
    %11 = arith.maximumf %9, %10 : vector<8x128xf32>
    %12 = arith.truncf %11 : vector<8x128xf32> to vector<8x128xbf16>
    %c0_10 = arith.constant 0 : index
    %c0_11 = arith.constant 0 : index
    %c0_12 = arith.constant 0 : index
    %13 = vector.load %arg3[%c0_10, %c0_11, %c0_12] : memref<2x128x128xbf16, #tpu.memory_space<vmem>>, vector<1x128x128xbf16>
    %14 = vector.shape_cast %13 : vector<1x128x128xbf16> to vector<128x128xbf16>
    %cst_13 = arith.constant dense<0.000000e+00> : vector<8x128xf32>
    %15 = tpu.matmul %12, %14, %cst_13 {dimension_numbers = #tpu.dot_dimension_numbers<[1], [0], [0], [1], [0, 0, 1, 1], [], []>} : vector<8x128xbf16>, vector<128x128xbf16>, vector<8x128xf32> -> vector<8x128xf32>
    %16 = vector.broadcast %1 : vector<1x128xf32> to vector<8x128xf32>
    %17 = arith.addf %15, %16 : vector<8x128xf32>
    %cst_14 = arith.constant 0.000000e+00 : f32
    %18 = vector.broadcast %cst_14 : f32 to vector<8x128xf32>
    %19 = arith.maximumf %17, %18 : vector<8x128xf32>
    %20 = arith.truncf %19 : vector<8x128xf32> to vector<8x128xbf16>
    %c1_15 = arith.constant 1 : index
    %c0_16 = arith.constant 0 : index
    %c0_17 = arith.constant 0 : index
    %21 = vector.load %arg3[%c1_15, %c0_16, %c0_17] : memref<2x128x128xbf16, #tpu.memory_space<vmem>>, vector<1x128x128xbf16>
    %22 = vector.shape_cast %21 : vector<1x128x128xbf16> to vector<128x128xbf16>
    %cst_18 = arith.constant dense<0.000000e+00> : vector<8x128xf32>
    %23 = tpu.matmul %20, %22, %cst_18 {dimension_numbers = #tpu.dot_dimension_numbers<[1], [0], [0], [1], [0, 0, 1, 1], [], []>} : vector<8x128xbf16>, vector<128x128xbf16>, vector<8x128xf32> -> vector<8x128xf32>
    %24 = vector.broadcast %2 : vector<1x128xf32> to vector<8x128xf32>
    %25 = arith.addf %23, %24 : vector<8x128xf32>
    %cst_19 = arith.constant 0.000000e+00 : f32
    %26 = vector.broadcast %cst_19 : f32 to vector<8x128xf32>
    %27 = arith.maximumf %25, %26 : vector<8x128xf32>
    %28 = vector.broadcast %3 : vector<1x128xf32> to vector<8x128xf32>
    %29 = arith.mulf %27, %28 : vector<8x128xf32>
    %cst_20 = arith.constant dense<0.000000e+00> : vector<8xf32>
    %30 = vector.multi_reduction <add>, %29, %cst_20 [1] : vector<8x128xf32> to vector<8xf32>
    %31 = vector.shape_cast %30 : vector<8xf32> to vector<8x1xf32>
    %32 = vector.broadcast %4 : vector<1x1xf32> to vector<8x1xf32>
    %33 = arith.addf %31, %32 : vector<8x1xf32>
    %34 = vector.shape_cast %33 : vector<8x1xf32> to vector<8x1xf32>
    %35 = vector.broadcast %34 : vector<8x1xf32> to vector<8x128xf32>
    %c0_21 = arith.constant 0 : index
    %c0_22 = arith.constant 0 : index
    %36 = vector.load %arg5[%c0_21, %c0_22] : memref<8x128xf32, #tpu.memory_space<vmem>>, vector<8x128xf32>
    tpu.vector_store %arg5[%c0_21, %c0_22], %35 {strides = array<i32>} : memref<8x128xf32, #tpu.memory_space<vmem>>, vector<8x128xf32>,
    return
  }
  func.func @transform_0(%arg0: i32) -> (i32, i32) {
    %c0_i32 = arith.constant 0 : i32
    %c0_i32_0 = arith.constant 0 : i32
    return %arg0, %c0_i32 : i32, i32
  }
  func.func @transform_1(%arg0: i32) -> (i32, i32) {
    %c0_i32 = arith.constant 0 : i32
    %c0_i32_0 = arith.constant 0 : i32
    %c0_i32_1 = arith.constant 0 : i32
    return %c0_i32, %c0_i32_0 : i32, i32
  }
  func.func @transform_2(%arg0: i32) -> (i32, i32, i32) {
    %c0_i32 = arith.constant 0 : i32
    %c0_i32_0 = arith.constant 0 : i32
    %c0_i32_1 = arith.constant 0 : i32
    %c0_i32_2 = arith.constant 0 : i32
    return %c0_i32, %c0_i32_0, %c0_i32_1 : i32, i32, i32
  }
  func.func @transform_3(%arg0: i32) -> (i32, i32) {
    %c0_i32 = arith.constant 0 : i32
    %c0_i32_0 = arith.constant 0 : i32
    %c0_i32_1 = arith.constant 0 : i32
    return %c0_i32, %c0_i32_0 : i32, i32
  }
  func.func @transform_4(%arg0: i32) -> (i32, i32) {
    %c0_i32 = arith.constant 0 : i32
    %c0_i32_0 = arith.constant 0 : i32
    return %arg0, %c0_i32 : i32, i32
  }
}

</mosaic_0001>

<bundles_post_ra>
// kernel: critic_pallas.1
= control target key start
LH: loop header
LB: loop body
LE: loop exit
PB: predicated region body
PF: predicated region fallthrough
CT: control target
= control target key end

     0   :  { %9 = vsyncpa [#allocation3], 0  ;;  %s489_s15 = smov [#allocation2]   ;;  %s583_s0 = inlined_call_operand.vmem [shape: bf16[8,32], index: 0, kind: input, shape index: {}]   ;;  %s584_s1 = inlined_call_operand.vmem [shape: bf16[32,128], index: 1, kind: input, shape index: {}]   ;;  %s585_s2 = inlined_call_operand.hbm [shape: bf16[2,128,128], index: 2, kind: input, shape index: {}]   ;;  %s586_s3 = inlined_call_operand.vmem [shape: f32[8,128], index: 3, kind: input, shape index: {}]   ;;  %s587_s4 = inlined_call_operand.vmem [shape: f32[8,128], index: 4, kind: output, shape index: {}]  }
   0x1   :  { %s19_s16 = sshll.u32 %s489_s15, 4  ;;  %s465_s19 = scalar_lea.hbm %s585_s2, 2048  ;;  %s20_s16 = int_to_ptr.vmem [resolvable:$true] %s19_s16 }
   0x2   :  { %p466_p0 = scmp.ne.s32.totalorder %s585_s2, %s465_s19  ;;  %p469_p1 = scmp.lt.u32.totalorder %s465_s19, %s585_s2 }
   0x4   :  { %p471_p2 = pnand %p469_p1, %p466_p0 }
   0x6   :  { %474 = shalt.err (!%p471_p2)
}
   0x7   :  { %s475_s24 = scalar_lea.vmem %s20_s16, 2048  ;;  %p480_p4 = scmp.lt.s32.totalorder %s20_s16, %s20_s16 }
   0x8   :  { %p476_p3 = scmp.ne.s32.totalorder %s20_s16, %s475_s24  ;;  %p481_p5 = scmp.lt.s32.totalorder %s475_s24, %s475_s24 }
   0xa   :  { %p482_p6 = por %p481_p5, %p480_p4 }
   0xc   :  { %p483_p7 = pnand %p482_p6, %p476_p3 }
   0xe   :  { %486 = shalt.err (!%p483_p7)
}
   0xf   :  { %s490_s25 = smov 64   ;;  %s491_s26 = smov 4  }
  0x10   :  { %25 = dma.hbm_to_vmem [thread:$0]  %s585_s2, 2048, %s20_s16, [#allocation3], %s490_s25, %s490_s25, %s491_s26  }
  0x11   :  { %487 = dma.done.wait [#allocation3], 2048  }
  0x12   :  { %488 = vsyncadd [#allocation3], 4294965248  ;;  %v492_v0 = vmov 0.0   ;;  %vm493_vm0 = vmmov 0   ;;  %v447_v1 = vld [vmem:[%s584_s1] sm:$0xff]   ;;  %v448_v2 = vld [vmem:[%s584_s1 + $0x8] sm:$0xff]  }
  0x13   :  { %392 = vmatprep.subr.bf16.mxu0 %v492_v0  ;;  %396 = vmatprep.mubr.msk.bf16.mxu0 %vm493_vm0, %v492_v0  ;;  %v449_v3 = vld [vmem:[#allocation2] sm:$0xff]   ;;  %vm58_vm1 = vcmask 261120   ;;  %v450_v4 = vld [vmem:[#allocation2 + $0x8] sm:$0xff]   ;;  %v451_v6 = vld [vmem:[#allocation2 + $0x10] sm:$0xff]   ;;  %v494_v45 = vmov 0  }
  0x14   :  { %400 = vmatprep.subr.bf16.mxu1 %v492_v0  ;;  %416 = vmatprep.mubr.msk.bf16.mxu1 %vm493_vm0, %v492_v0  ;;  %v37_v5 = vld [vmem:[%s583_s0] sm:$0xf]  ;;  %v452_v7 = vld [vmem:[#allocation2 + $0x18] sm:$0xff]   ;;  %v454_v9 = vld [vmem:[#allocation2 + $0x28] sm:$0xff]  }
  0x15   :  { %393 = vmatpush3.bf16.msra.mxu0 %v447_v1  ;;  %401 = vmatpush3.bf16.msra.mxu1 %v449_v3  ;;  %v453_v8 = vld [vmem:[#allocation2 + $0x20] sm:$0xff]   ;;  %v455_v10 = vld [vmem:[#allocation2 + $0x30] sm:$0xff]   ;;  %v456_v11 = vld [vmem:[#allocation2 + $0x38] sm:$0xff]  }
  0x16   :  { %394 = vmatprep.subr.bf16.mxu0 %v492_v0  ;;  %402 = vmatprep.subr.bf16.mxu1 %v492_v0  ;;  %v457_v12 = vld [vmem:[#allocation2 + $0x40] sm:$0xff]   ;;  %v458_v13 = vld [vmem:[#allocation2 + $0x48] sm:$0xff]   ;;  %v459_v14 = vld [vmem:[#allocation2 + $0x50] sm:$0xff]  }
  0x17   :  { %v460_v15 = vld [vmem:[#allocation2 + $0x58] sm:$0xff]   ;;  %v461_v16 = vld [vmem:[#allocation2 + $0x60] sm:$0xff]   ;;  %v462_v17 = vld [vmem:[#allocation2 + $0x68] sm:$0xff]   ;;  %446 = vset.pattern.permute.xlu0 %v494_v45 }
  0x18   :  { %v347_v18 = vld [vmem:[%s586_s3] ss:$0 sm:$0xff]  ;;  %v463_v26 = vld [vmem:[#allocation2 + $0x70] sm:$0xff]   ;;  %v464_v27 = vld [vmem:[#allocation2 + $0x78] sm:$0xff]  }
  0x19   :  { %395 = vmatpush3.bf16.msra.mxu0 %v448_v2  ;;  %403 = vmatpush3.bf16.msra.mxu1 %v450_v4  ;;  %v351_v28 = vld [vmem:[%s586_s3 + $0x1] ss:$0 sm:$0xff]  ;;  %v360_v36 = vld [vmem:[%s586_s3 + $0x2] ss:$0 sm:$0xff]  ;;  %v369_v41 = vld [vmem:[%s586_s3 + $0x3] ss:$0 sm:$0xff] }
  0x1a   :  { %420 = vmatprep.subr.bf16.mxu0 %v492_v0  ;;  %404 = vmatprep.subr.bf16.mxu1 %v492_v0  ;;  %v370_v46 = vld [vmem:[%s586_s3 + $0x4] ss:$0 sm:$0xff] }
  0x1c   :  { %397 = vmatmul.mubr.msk.bf16.vlgmr.msra.gmra.mrb[0].mxu0 %vm58_vm1, %v37_v5 }
  0x1d   :  { %436 = vmatprep.mubr.msk.bf16.mxu0 %vm493_vm0, %v492_v0  ;;  %405 = vmatpush3.bf16.msra.mxu1 %v451_v6 }
  0x1e   :  { %406 = vmatprep.subr.bf16.mxu1 %v492_v0  ;;  %421 = vmatpush3.bf16.msra.mxu0 %v457_v12 }
  0x1f   :  { %422 = vmatprep.subr.bf16.mxu0 %v492_v0 }
  0x21   :  { %407 = vmatpush3.bf16.msra.mxu1 %v452_v7 }
  0x22   :  { %408 = vmatprep.subr.bf16.mxu1 %v492_v0  ;;  %423 = vmatpush3.bf16.msra.mxu0 %v458_v13 }
  0x23   :  { %424 = vmatprep.subr.bf16.mxu0 %v492_v0 }
  0x25   :  { %409 = vmatpush3.bf16.msra.mxu1 %v453_v8 }
  0x26   :  { %410 = vmatprep.subr.bf16.mxu1 %v492_v0  ;;  %425 = vmatpush3.bf16.msra.mxu0 %v459_v14 }
  0x27   :  { %426 = vmatprep.subr.bf16.mxu0 %v492_v0 }
  0x29   :  { %411 = vmatpush3.bf16.msra.mxu1 %v454_v9 }
  0x2a   :  { %412 = vmatprep.subr.bf16.mxu1 %v492_v0  ;;  %427 = vmatpush3.bf16.msra.mxu0 %v460_v15 }
  0x2b   :  { %428 = vmatprep.subr.bf16.mxu0 %v492_v0 }
  0x2d   :  { %413 = vmatpush3.bf16.msra.mxu1 %v455_v10 }
  0x2e   :  { %414 = vmatprep.subr.bf16.mxu1 %v492_v0  ;;  %429 = vmatpush3.bf16.msra.mxu0 %v461_v16 }
  0x2f   :  { %430 = vmatprep.subr.bf16.mxu0 %v492_v0 }
  0x31   :  { %415 = vmatpush3.bf16.msra.mxu1 %v456_v11 }
  0x32   :  { %431 = vmatpush3.bf16.msra.mxu0 %v462_v17 }
  0x33   :  { %432 = vmatprep.subr.bf16.mxu0 %v492_v0 }
  0x36   :  { %433 = vmatpush3.bf16.msra.mxu0 %v463_v26 }
  0x37   :  { %434 = vmatprep.subr.bf16.mxu0 %v492_v0 }
  0x3a   :  { %435 = vmatpush3.bf16.msra.mxu0 %v464_v27 }
  0xef   :  { %v96_v19 = vpop.f32.mrb[0].mxu0 }
  0xf0   :  { %v97_v20 = vadd.f32 %v347_v18, %v96_v19  ;;  %v398_v21 = vpop.f32.mrb[1].mxu0 }
  0xf1   :  { %v99_v22 = vpop.f32.mrb[2].mxu0 }
  0xf2   :  { %v102_v23 = vmax.f32 %v97_v20, 0.0  ;;  %v399_v24 = vpop.f32.mrb[3].mxu0 }
  0xf4   :  { %v103_v25 = vpack.c.bf16 %v102_v23, %v102_v23 }
  0xf6   :  { %417 = vmatmul.mubr.bf16.vlgmr.msra.gmra.mrb[0].mxu1 %v103_v25 }
 0x1c9   :  { %v206_v29 = vpop.f32.mrb[0].mxu1 }
 0x1ca   :  { %v207_v30 = vadd.f32 %v351_v28, %v206_v29  ;;  %v418_v31 = vpop.f32.mrb[1].mxu1 }
 0x1cb   :  { %v209_v32 = vpop.f32.mrb[2].mxu1 }
 0x1cc   :  { %v212_v33 = vmax.f32 %v207_v30, 0.0  ;;  %v419_v34 = vpop.f32.mrb[3].mxu1 }
 0x1ce   :  { %v213_v35 = vpack.c.bf16 %v212_v33, %v212_v33 }
 0x1d0   :  { %437 = vmatmul.mubr.bf16.vlgmr.msra.gmra.mrb[4].mxu0 %v213_v35 }
 0x2a3   :  { %v317_v37 = vpop.f32.mrb[4].mxu0 }
 0x2a4   :  { %v318_v38 = vadd.f32 %v360_v36, %v317_v37  ;;  %v438_v39 = vpop.f32.mrb[5].mxu0 }
 0x2a5   :  { %v320_v40 = vpop.f32.mrb[6].mxu0 }
 0x2a6   :  { %v323_v42 = vmax.f32 %v318_v38, 0.0  ;;  %v439_v43 = vpop.f32.mrb[7].mxu0 }
 0x2a8   :  { %v328_v44 = vmul.f32 %v369_v41, %v323_v42 }
 0x2aa   :  { %329 = vadd.xlane.f32.xlu0 %v328_v44 }
 0x337   :  { %v330_v47 = vpop.xlane.xlu0 %329 }
 0x338   :  { %v335_v48 = vadd.f32 %v370_v46, %v330_v47 }
 0x33a   :  { %338 = vperm.xlu0 %446, %v335_v48  }
 0x3b9   :  { %v339_v49 = vpop.permute.xlu0 %338 }
 0x3ba   :  { %341 = vst [vmem:[%s587_s4] sm:$0xff] %v339_v49 }
 0x3bb   :  { %346 = vsyncpa [#allocation3], 1 }

</bundles_post_ra>
